<compile_context>
chip_gen: v7x
topology: tpu7x:2x2x1
jax: 0.10.0
libtpu: 0.0.40
codegen_flags: <defaults>
</compile_context>

<pallas_src>
import jax
import jax.numpy as jnp
from jax.experimental import pallas as pl
from jax.experimental.pallas import tpu as pltpu

_LANE = 128          # vreg lane width
_SUBLANE_BF16 = 16   # bf16 packs 16 rows per sublane group


def _round_up(x, m):
    return (x + m - 1) // m * m


def actor_kernel(s_ref, w1_ref, b1_ref, w2_ref, b2_ref,
                 w3_ref, b3_ref, w4_ref, b4_ref, bound_ref, out_ref):
    """One (TILE_B, feat) batch tile: 4 dense layers, ReLU x3, tanh, bound."""
    x = s_ref[...]   # already bf16 (cast/padded once outside the kernel)

    # f32 MXU accumulation; fused bias+ReLU+cast so only the bf16 copy of each
    # inter-layer intermediate is materialized (single vst per intermediate).
    h = jnp.maximum(
        jnp.dot(x, w1_ref[...], preferred_element_type=jnp.float32) + b1_ref[...],
        0.0).astype(jnp.bfloat16)
    h = jnp.maximum(
        jnp.dot(h, w2_ref[...], preferred_element_type=jnp.float32) + b2_ref[...],
        0.0).astype(jnp.bfloat16)
    h = jnp.maximum(
        jnp.dot(h, w3_ref[...], preferred_element_type=jnp.float32) + b3_ref[...],
        0.0).astype(jnp.bfloat16)
    a = jnp.tanh(
        jnp.dot(h, w4_ref[...], preferred_element_type=jnp.float32) + b4_ref[...])

    # Per-lane action bound (supports scalar or per-action bounds); bf16 output
    # halves HBM writeback while keeping the 128-lane unmasked-vst store path.
    out_ref[...] = (a * bound_ref[...]).astype(out_ref.dtype)


def prepare_actor_params(params, action_bound):
    """Pad + bf16-cast weights ONCE (hoisted out of the per-forward path).

    params = ((w1,b1),(w2,b2),(w3,b3),(w4,b4)); w_i: [in,out], b_i: [1,out].
    """
    (w1, b1), (w2, b2), (w3, b3), (w4, b4) = params
    state_dim, hidden_dim = w1.shape
    action_dim = w4.shape[1]

    # Hidden/action lanes -> 128 (full lanes, unmasked stores). State rows only
    # to the bf16 sublane pack (16): no 16->128 inflation of input HBM traffic.
    # (If hidden_dim ever grows MXU-bound on v6e/v7x, pad h_pad to 256 there.)
    s_pad = _round_up(state_dim, _SUBLANE_BF16)
    h_pad = _round_up(hidden_dim, _LANE)
    a_pad = _round_up(action_dim, _LANE)

    bf16, f32 = jnp.bfloat16, jnp.float32

    def pad_w(w, rows, cols):
        return (jnp.zeros((rows, cols), bf16)
                .at[:w.shape[0], :w.shape[1]].set(w.astype(bf16)))

    def pad_b(b, cols):
        return jnp.zeros((1, cols), f32).at[:, :b.shape[1]].set(b.astype(f32))

    bound = jnp.broadcast_to(
        jnp.asarray(action_bound, f32).reshape(1, -1), (1, action_dim))
    bound_p = jnp.zeros((1, a_pad), f32).at[:, :action_dim].set(bound)

    return dict(
        w1=pad_w(w1, s_pad, h_pad), b1=pad_b(b1, h_pad),
        w2=pad_w(w2, h_pad, h_pad), b2=pad_b(b2, h_pad),
        w3=pad_w(w3, h_pad, h_pad), b3=pad_b(b3, h_pad),
        w4=pad_w(w4, h_pad, a_pad), b4=pad_b(b4, a_pad),
        bound=bound_p,
        state_dim=state_dim, action_dim=action_dim,
        s_pad=s_pad, h_pad=h_pad, a_pad=a_pad,
    )


def _choose_tile_b(B, tile_b):
    """Multiple of 16 (bf16 packing), large to amortize per-step overhead, and
    split so large batches give >= 2 'parallel' steps (both v7x TCs work)."""
    b_ceil = _round_up(B, _SUBLANE_BF16)
    tile_b = _round_up(max(tile_b, _SUBLANE_BF16), _SUBLANE_BF16)
    tile_b = min(tile_b, b_ceil)
    if b_ceil > _SUBLANE_BF16 and tile_b >= b_ceil:
        tile_b = _round_up(pl.cdiv(b_ceil, 2), _SUBLANE_BF16)
    return tile_b


def actor_forward(s, prepared, *, tile_b=1024):
    """s: [B, state_dim] activations; prepared: output of prepare_actor_params."""
    p = prepared
    B = s.shape[0]
    state_dim, action_dim = p["state_dim"], p["action_dim"]
    s_pad, h_pad, a_pad = p["s_pad"], p["h_pad"], p["a_pad"]

    tb = _choose_tile_b(B, tile_b)
    b_pad = _round_up(B, tb)
    grid = (b_pad // tb,)

    # Single small bf16 pad+cast (skipped entirely when shapes already align).
    s_bf = s.astype(jnp.bfloat16)
    if (b_pad, s_pad) == (B, state_dim):
        s_p = s_bf
    else:
        s_p = jnp.zeros((b_pad, s_pad), jnp.bfloat16).at[:B, :state_dim].set(s_bf)

    const = lambda i: (0, 0)   # resident weights / biases / bound row

    out_p = pl.pallas_call(
        actor_kernel,
        out_shape=jax.ShapeDtypeStruct((b_pad, a_pad), jnp.bfloat16),
        grid=grid,
        in_specs=[
            pl.BlockSpec((tb, s_pad), lambda i: (i, 0)),   # s tile (bf16)
            pl.BlockSpec((s_pad, h_pad), const),           # w1
            pl.BlockSpec((1, h_pad), const),               # b1
            pl.BlockSpec((h_pad, h_pad), const),           # w2
            pl.BlockSpec((1, h_pad), const),               # b2
            pl.BlockSpec((h_pad, h_pad), const),           # w3
            pl.BlockSpec((1, h_pad), const),               # b3
            pl.BlockSpec((h_pad, a_pad), const),           # w4
            pl.BlockSpec((1, a_pad), const),               # b4
            pl.BlockSpec((1, a_pad), const),               # action_bound row
        ],
        out_specs=pl.BlockSpec((tb, a_pad), lambda i: (i, 0)),
        compiler_params=pltpu.CompilerParams(
            dimension_semantics=("parallel",)),
    )(s_p, p["w1"], p["b1"], p["w2"], p["b2"],
      p["w3"], p["b3"], p["w4"], p["b4"], p["bound"])

    return out_p[:B, :action_dim].astype(s.dtype)


def init_linear(key, fan_in, fan_out):
    """Deterministic PyTorch-style Linear init: U(-1/sqrt(fan_in), 1/sqrt(fan_in))."""
    kw, kb = jax.random.split(key)
    bound = 1.0 / jnp.sqrt(jnp.float32(fan_in))
    w = jax.random.uniform(kw, (fan_in, fan_out), jnp.float32, -bound, bound)
    b = jax.random.uniform(kb, (1, fan_out), jnp.float32, -bound, bound)
    return w, b


def reference_forward(s, params, action_bound):
    (w1, b1), (w2, b2), (w3, b3), (w4, b4) = params
    h = jnp.maximum(s @ w1 + b1, 0.0)
    h = jnp.maximum(h @ w2 + b2, 0.0)
    h = jnp.maximum(h @ w3 + b3, 0.0)
    return jnp.tanh(h @ w4 + b4) * jnp.asarray(action_bound, jnp.float32)


if __name__ == "__main__":
    # Small shapes consistent with the module.
    batch, state_dim, hidden_dim, action_dim = 2, 16, 32, 4
    action_bound = 2.0

    key = jax.random.PRNGKey(0)
    k_s, k1, k2, k3, k4 = jax.random.split(key, 5)

    s = jax.random.normal(k_s, (batch, state_dim), dtype=jnp.float32)
    params = (
        init_linear(k1, state_dim, hidden_dim),
        init_linear(k2, hidden_dim, hidden_dim),
        init_linear(k3, hidden_dim, hidden_dim),
        init_linear(k4, hidden_dim, action_dim),
    )
    prepared = prepare_actor_params(params, action_bound)  # pad/cast ONCE

    # --- small batch (single grid step, batch padded to 16 bf16 rows) ---
    out = jax.block_until_ready(actor_forward(s, prepared))
    ref = reference_forward(s, params, action_bound)
    assert out.shape == (batch, action_dim)
    # bf16 matmul inputs / bf16 output with f32 accumulation -> relaxed tol.
    assert jnp.allclose(out, ref, atol=5e-2, rtol=5e-2)

    # --- larger batch exercising the multi-tile pipelined grid ---
    big_b = 300
    s_big = jax.random.normal(jax.random.PRNGKey(1), (big_b, state_dim),
                              dtype=jnp.float32)
    ref_big = reference_forward(s_big, params, action_bound)

    out_big = jax.block_until_ready(actor_forward(s_big, prepared, tile_b=128))
    assert out_big.shape == (big_b, action_dim)
    assert jnp.allclose(out_big, ref_big, atol=5e-2, rtol=5e-2)

    # --- default tile path: auto-splits into >= 2 parallel grid steps ---
    out_def = jax.block_until_ready(actor_forward(s_big, prepared))
    assert jnp.allclose(out_def, ref_big, atol=5e-2, rtol=5e-2)

    print("KERNEL_OK")
</pallas_src>

<mosaic_0001>
module attributes {stable_mosaic.version = 11 : i64} {
  func.func @actor_kernel(%arg0: i32, %arg1: memref<16x16xbf16, #tpu.memory_space<vmem>>, %arg2: memref<16x128xbf16, #tpu.memory_space<vmem>>, %arg3: memref<1x128xf32, #tpu.memory_space<vmem>>, %arg4: memref<128x128xbf16, #tpu.memory_space<vmem>>, %arg5: memref<1x128xf32, #tpu.memory_space<vmem>>, %arg6: memref<128x128xbf16, #tpu.memory_space<vmem>>, %arg7: memref<1x128xf32, #tpu.memory_space<vmem>>, %arg8: memref<128x128xbf16, #tpu.memory_space<vmem>>, %arg9: memref<1x128xf32, #tpu.memory_space<vmem>>, %arg10: memref<1x128xf32, #tpu.memory_space<vmem>>, %arg11: memref<16x128xbf16, #tpu.memory_space<vmem>>) attributes {dimension_semantics = [#tpu.dimension_semantics<parallel>], iteration_bounds = array<i64: 1>, scalar_prefetch = 0 : i64, scratch_operands = 0 : i64, tpu.core_type = #tpu.core_type<tc>, window_params = [{transform_indices = @transform_0, window_bounds = array<i64: 16, 16>}, {pipeline_mode = #tpu.pipeline_mode<synchronous>, transform_indices = @transform_1, window_bounds = array<i64: 16, 128>}, {pipeline_mode = #tpu.pipeline_mode<synchronous>, transform_indices = @transform_2, window_bounds = array<i64: 1, 128>}, {pipeline_mode = #tpu.pipeline_mode<synchronous>, transform_indices = @transform_3, window_bounds = array<i64: 128, 128>}, {pipeline_mode = #tpu.pipeline_mode<synchronous>, transform_indices = @transform_4, window_bounds = array<i64: 1, 128>}, {pipeline_mode = #tpu.pipeline_mode<synchronous>, transform_indices = @transform_5, window_bounds = array<i64: 128, 128>}, {pipeline_mode = #tpu.pipeline_mode<synchronous>, transform_indices = @transform_6, window_bounds = array<i64: 1, 128>}, {pipeline_mode = #tpu.pipeline_mode<synchronous>, transform_indices = @transform_7, window_bounds = array<i64: 128, 128>}, {pipeline_mode = #tpu.pipeline_mode<synchronous>, transform_indices = @transform_8, window_bounds = array<i64: 1, 128>}, {pipeline_mode = #tpu.pipeline_mode<synchronous>, transform_indices = @transform_9, window_bounds = array<i64: 1, 128>}, {transform_indices = @transform_10, window_bounds = array<i64: 16, 128>}]} {
    %c0 = arith.constant 0 : index
    %c0_0 = arith.constant 0 : index
    %0 = vector.load %arg1[%c0, %c0_0] : memref<16x16xbf16, #tpu.memory_space<vmem>>, vector<16x16xbf16>
    %c0_1 = arith.constant 0 : index
    %c0_2 = arith.constant 0 : index
    %1 = vector.load %arg2[%c0_1, %c0_2] : memref<16x128xbf16, #tpu.memory_space<vmem>>, vector<16x128xbf16>
    %cst = arith.constant dense<0.000000e+00> : vector<16x128xf32>
    %2 = tpu.matmul %0, %1, %cst {dimension_numbers = #tpu.dot_dimension_numbers<[1], [0], [0], [1], [0, 0, 1, 1], [], []>} : vector<16x16xbf16>, vector<16x128xbf16>, vector<16x128xf32> -> vector<16x128xf32>
    %c0_3 = arith.constant 0 : index
    %c0_4 = arith.constant 0 : index
    %3 = vector.load %arg3[%c0_3, %c0_4] : memref<1x128xf32, #tpu.memory_space<vmem>>, vector<1x128xf32>
    %4 = vector.broadcast %3 : vector<1x128xf32> to vector<16x128xf32>
    %5 = arith.addf %2, %4 : vector<16x128xf32>
    %cst_5 = arith.constant 0.000000e+00 : f32
    %6 = vector.broadcast %cst_5 : f32 to vector<16x128xf32>
    %7 = arith.maximumf %5, %6 : vector<16x128xf32>
    %8 = arith.truncf %7 : vector<16x128xf32> to vector<16x128xbf16>
    %c0_6 = arith.constant 0 : index
    %c0_7 = arith.constant 0 : index
    %9 = vector.load %arg4[%c0_6, %c0_7] : memref<128x128xbf16, #tpu.memory_space<vmem>>, vector<128x128xbf16>
    %cst_8 = arith.constant dense<0.000000e+00> : vector<16x128xf32>
    %10 = tpu.matmul %8, %9, %cst_8 {dimension_numbers = #tpu.dot_dimension_numbers<[1], [0], [0], [1], [0, 0, 1, 1], [], []>} : vector<16x128xbf16>, vector<128x128xbf16>, vector<16x128xf32> -> vector<16x128xf32>
    %c0_9 = arith.constant 0 : index
    %c0_10 = arith.constant 0 : index
    %11 = vector.load %arg5[%c0_9, %c0_10] : memref<1x128xf32, #tpu.memory_space<vmem>>, vector<1x128xf32>
    %12 = vector.broadcast %11 : vector<1x128xf32> to vector<16x128xf32>
    %13 = arith.addf %10, %12 : vector<16x128xf32>
    %cst_11 = arith.constant 0.000000e+00 : f32
    %14 = vector.broadcast %cst_11 : f32 to vector<16x128xf32>
    %15 = arith.maximumf %13, %14 : vector<16x128xf32>
    %16 = arith.truncf %15 : vector<16x128xf32> to vector<16x128xbf16>
    %c0_12 = arith.constant 0 : index
    %c0_13 = arith.constant 0 : index
    %17 = vector.load %arg6[%c0_12, %c0_13] : memref<128x128xbf16, #tpu.memory_space<vmem>>, vector<128x128xbf16>
    %cst_14 = arith.constant dense<0.000000e+00> : vector<16x128xf32>
    %18 = tpu.matmul %16, %17, %cst_14 {dimension_numbers = #tpu.dot_dimension_numbers<[1], [0], [0], [1], [0, 0, 1, 1], [], []>} : vector<16x128xbf16>, vector<128x128xbf16>, vector<16x128xf32> -> vector<16x128xf32>
    %c0_15 = arith.constant 0 : index
    %c0_16 = arith.constant 0 : index
    %19 = vector.load %arg7[%c0_15, %c0_16] : memref<1x128xf32, #tpu.memory_space<vmem>>, vector<1x128xf32>
    %20 = vector.broadcast %19 : vector<1x128xf32> to vector<16x128xf32>
    %21 = arith.addf %18, %20 : vector<16x128xf32>
    %cst_17 = arith.constant 0.000000e+00 : f32
    %22 = vector.broadcast %cst_17 : f32 to vector<16x128xf32>
    %23 = arith.maximumf %21, %22 : vector<16x128xf32>
    %24 = arith.truncf %23 : vector<16x128xf32> to vector<16x128xbf16>
    %c0_18 = arith.constant 0 : index
    %c0_19 = arith.constant 0 : index
    %25 = vector.load %arg8[%c0_18, %c0_19] : memref<128x128xbf16, #tpu.memory_space<vmem>>, vector<128x128xbf16>
    %cst_20 = arith.constant dense<0.000000e+00> : vector<16x128xf32>
    %26 = tpu.matmul %24, %25, %cst_20 {dimension_numbers = #tpu.dot_dimension_numbers<[1], [0], [0], [1], [0, 0, 1, 1], [], []>} : vector<16x128xbf16>, vector<128x128xbf16>, vector<16x128xf32> -> vector<16x128xf32>
    %c0_21 = arith.constant 0 : index
    %c0_22 = arith.constant 0 : index
    %27 = vector.load %arg9[%c0_21, %c0_22] : memref<1x128xf32, #tpu.memory_space<vmem>>, vector<1x128xf32>
    %28 = vector.broadcast %27 : vector<1x128xf32> to vector<16x128xf32>
    %29 = arith.addf %26, %28 : vector<16x128xf32>
    %30 = math.tanh %29 : vector<16x128xf32>
    %c0_23 = arith.constant 0 : index
    %c0_24 = arith.constant 0 : index
    %31 = vector.load %arg10[%c0_23, %c0_24] : memref<1x128xf32, #tpu.memory_space<vmem>>, vector<1x128xf32>
    %32 = vector.broadcast %31 : vector<1x128xf32> to vector<16x128xf32>
    %33 = arith.mulf %30, %32 : vector<16x128xf32>
    %34 = arith.truncf %33 : vector<16x128xf32> to vector<16x128xbf16>
    %c0_25 = arith.constant 0 : index
    %c0_26 = arith.constant 0 : index
    %35 = vector.load %arg11[%c0_25, %c0_26] : memref<16x128xbf16, #tpu.memory_space<vmem>>, vector<16x128xbf16>
    tpu.vector_store %arg11[%c0_25, %c0_26], %34 {strides = array<i32>} : memref<16x128xbf16, #tpu.memory_space<vmem>>, vector<16x128xbf16>,
    return
  }
  func.func @transform_0(%arg0: i32) -> (i32, i32) {
    %c0_i32 = arith.constant 0 : i32
    %c0_i32_0 = arith.constant 0 : i32
    return %arg0, %c0_i32 : i32, i32
  }
  func.func @transform_1(%arg0: i32) -> (i32, i32) {
    %c0_i32 = arith.constant 0 : i32
    %c0_i32_0 = arith.constant 0 : i32
    %c0_i32_1 = arith.constant 0 : i32
    return %c0_i32, %c0_i32_0 : i32, i32
  }
  func.func @transform_2(%arg0: i32) -> (i32, i32) {
    %c0_i32 = arith.constant 0 : i32
    %c0_i32_0 = arith.constant 0 : i32
    %c0_i32_1 = arith.constant 0 : i32
    return %c0_i32, %c0_i32_0 : i32, i32
  }
  func.func @transform_3(%arg0: i32) -> (i32, i32) {
    %c0_i32 = arith.constant 0 : i32
    %c0_i32_0 = arith.constant 0 : i32
    %c0_i32_1 = arith.constant 0 : i32
    return %c0_i32, %c0_i32_0 : i32, i32
  }
  func.func @transform_4(%arg0: i32) -> (i32, i32) {
    %c0_i32 = arith.constant 0 : i32
    %c0_i32_0 = arith.constant 0 : i32
    %c0_i32_1 = arith.constant 0 : i32
    return %c0_i32, %c0_i32_0 : i32, i32
  }
  func.func @transform_5(%arg0: i32) -> (i32, i32) {
    %c0_i32 = arith.constant 0 : i32
    %c0_i32_0 = arith.constant 0 : i32
    %c0_i32_1 = arith.constant 0 : i32
    return %c0_i32, %c0_i32_0 : i32, i32
  }
  func.func @transform_6(%arg0: i32) -> (i32, i32) {
    %c0_i32 = arith.constant 0 : i32
    %c0_i32_0 = arith.constant 0 : i32
    %c0_i32_1 = arith.constant 0 : i32
    return %c0_i32, %c0_i32_0 : i32, i32
  }
  func.func @transform_7(%arg0: i32) -> (i32, i32) {
    %c0_i32 = arith.constant 0 : i32
    %c0_i32_0 = arith.constant 0 : i32
    %c0_i32_1 = arith.constant 0 : i32
    return %c0_i32, %c0_i32_0 : i32, i32
  }
  func.func @transform_8(%arg0: i32) -> (i32, i32) {
    %c0_i32 = arith.constant 0 : i32
    %c0_i32_0 = arith.constant 0 : i32
    %c0_i32_1 = arith.constant 0 : i32
    return %c0_i32, %c0_i32_0 : i32, i32
  }
  func.func @transform_9(%arg0: i32) -> (i32, i32) {
    %c0_i32 = arith.constant 0 : i32
    %c0_i32_0 = arith.constant 0 : i32
    %c0_i32_1 = arith.constant 0 : i32
    return %c0_i32, %c0_i32_0 : i32, i32
  }
  func.func @transform_10(%arg0: i32) -> (i32, i32) {
    %c0_i32 = arith.constant 0 : i32
    %c0_i32_0 = arith.constant 0 : i32
    return %arg0, %c0_i32 : i32, i32
  }
}

</mosaic_0001>

<bundles_post_ra>
// kernel: tpu_custom_call.1
= control target key start
LH: loop header
LB: loop body
LE: loop exit
PB: predicated region body
PF: predicated region fallthrough
CT: control target
= control target key end

     0   :  { %15 = vsyncpa [#allocation3], 0  ;;  %s1090_s0 = inlined_call_operand.hbm [shape: bf16[16,16], index: 0, kind: input, shape index: {}]   ;;  %s1091_s1 = inlined_call_operand.hbm [shape: bf16[16,128], index: 1, kind: input, shape index: {}]   ;;  %s1092_s2 = inlined_call_operand.vmem [shape: f32[1,128], index: 2, kind: input, shape index: {}]   ;;  %s1093_s3 = inlined_call_operand.hbm [shape: bf16[128,128], index: 3, kind: input, shape index: {}]   ;;  %s1094_s4 = inlined_call_operand.vmem [shape: f32[1,128], index: 4, kind: input, shape index: {}]   ;;  %s1095_s5 = inlined_call_operand.hbm [shape: bf16[128,128], index: 5, kind: input, shape index: {}]   ;;  %s1096_s6 = inlined_call_operand.vmem [shape: f32[1,128], index: 6, kind: input, shape index: {}]   ;;  %s1097_s7 = inlined_call_operand.hbm [shape: bf16[128,128], index: 7, kind: input, shape index: {}]   ;;  %s1098_s8 = inlined_call_operand.vmem [shape: f32[1,128], index: 8, kind: input, shape index: {}]   ;;  %s1099_s9 = inlined_call_operand.vmem [shape: f32[1,128], index: 9, kind: input, shape index: {}]   ;;  %s1100_s10 = inlined_call_operand.hbm [shape: bf16[16,128], index: 10, kind: output, shape index: {}]  }
   0x1   :  { %16 = vsyncpa [#allocation6], 0 }
   0x2   :  { %17 = vsyncpa [#allocation9], 0 }
   0x3   :  { %18 = vsyncpa [#allocation4], 0  ;;  %s873_s13 = smov [#allocation5]   ;;  %s874_s15 = smov [#allocation8]  }
   0x4   :  { %s36_s14 = sshll.u32 %s873_s13, 4  ;;  %s64_s16 = sshll.u32 %s874_s15, 4  ;;  %s37_s14 = int_to_ptr.vmem [resolvable:$true] %s36_s14  ;;  %s938_s16 = int_to_ptr.vmem [resolvable:$true] %s64_s16 }
   0x5   :  { %s733_s19 = scalar_lea.hbm %s1091_s1, 128 }
   0x6   :  { %p734_p0 = scmp.ne.s32.totalorder %s1091_s1, %s733_s19  ;;  %p737_p1 = scmp.lt.u32.totalorder %s733_s19, %s1091_s1 }
   0x8   :  { %p739_p2 = pnand %p737_p1, %p734_p0 }
   0xa   :  { %742 = shalt.err (!%p739_p2)
}
   0xb   :  { %s743_s24 = scalar_lea.vmem %s37_s14, 128  ;;  %p748_p4 = scmp.lt.s32.totalorder %s37_s14, %s37_s14 }
   0xc   :  { %p744_p3 = scmp.ne.s32.totalorder %s37_s14, %s743_s24  ;;  %p749_p5 = scmp.lt.s32.totalorder %s743_s24, %s743_s24 }
   0xe   :  { %p750_p6 = por %p749_p5, %p748_p4 }
  0x10   :  { %p751_p7 = pnand %p750_p6, %p744_p3 }
  0x12   :  { %754 = shalt.err (!%p751_p7)
}
  0x13   :  { %s875_s25 = smov 64   ;;  %s876_s26 = smov 4  }
  0x14   :  { %42 = dma.hbm_to_vmem [thread:$0]  %s1091_s1, 128, %s37_s14, [#allocation6], %s875_s25, %s875_s25, %s876_s26  }
  0x15   :  { %s755_s11 = scalar_lea.hbm %s1095_s5, 1024 }
  0x16   :  { %p756_p8 = scmp.ne.s32.totalorder %s1095_s5, %s755_s11  ;;  %p759_p9 = scmp.lt.u32.totalorder %s755_s11, %s1095_s5 }
  0x18   :  { %p761_p10 = pnand %p759_p9, %p756_p8 }
  0x1a   :  { %764 = shalt.err (!%p761_p10)
}
  0x1b   :  { %s765_s18 = scalar_lea.vmem %s938_s16, 1024  ;;  %p770_p12 = scmp.lt.s32.totalorder %s938_s16, %s938_s16 }
  0x1c   :  { %p766_p11 = scmp.ne.s32.totalorder %s938_s16, %s765_s18  ;;  %p771_p13 = scmp.lt.s32.totalorder %s765_s18, %s765_s18 }
  0x1e   :  { %p772_p0 = por %p771_p13, %p770_p12 }
  0x20   :  { %p773_p1 = pnand %p772_p0, %p766_p11 }
  0x22   :  { %776 = shalt.err (!%p773_p1)
}
  0x23   :  { %70 = dma.hbm_to_vmem [thread:$0]  %s1095_s5, 1024, %s938_s16, [#allocation9], %s875_s25, %s875_s25, %s876_s26  }
  0x24   :  { %s877_s19 = smov [#allocation2]   ;;  %s878_s21 = smov [#allocation7]  }
  0x25   :  { %s24_s20 = sshll.u32 %s877_s19, 4  ;;  %s50_s22 = sshll.u32 %s878_s21, 4  ;;  %s25_s20 = int_to_ptr.vmem [resolvable:$true] %s24_s20  ;;  %s975_s22 = int_to_ptr.vmem [resolvable:$true] %s50_s22 }
  0x26   :  { %s777_s27 = scalar_lea.hbm %s1090_s0, 128 }
  0x27   :  { %p778_p2 = scmp.ne.s32.totalorder %s1090_s0, %s777_s27  ;;  %p781_p3 = scmp.lt.u32.totalorder %s777_s27, %s1090_s0 }
  0x29   :  { %p783_p4 = pnand %p781_p3, %p778_p2 }
  0x2b   :  { %786 = shalt.err (!%p783_p4)
}
  0x2c   :  { %s787_s5 = scalar_lea.vmem %s25_s20, 128  ;;  %p792_p6 = scmp.lt.s32.totalorder %s25_s20, %s25_s20 }
  0x2d   :  { %p788_p5 = scmp.ne.s32.totalorder %s25_s20, %s787_s5  ;;  %p793_p7 = scmp.lt.s32.totalorder %s787_s5, %s787_s5 }
  0x2f   :  { %p794_p8 = por %p793_p7, %p792_p6 }
  0x31   :  { %p795_p9 = pnand %p794_p8, %p788_p5 }
  0x33   :  { %798 = shalt.err (!%p795_p9)
}
  0x34   :  { %30 = dma.hbm_to_vmem [thread:$0]  %s1090_s0, 128, %s25_s20, [#allocation3], %s875_s25, %s875_s25, %s876_s26  }
  0x35   :  { %s799_s17 = scalar_lea.hbm %s1093_s3, 1024 }
  0x36   :  { %p800_p10 = scmp.ne.s32.totalorder %s1093_s3, %s799_s17  ;;  %p803_p11 = scmp.lt.u32.totalorder %s799_s17, %s1093_s3 }
  0x38   :  { %p805_p12 = pnand %p803_p11, %p800_p10 }
  0x3a   :  { %808 = shalt.err (!%p805_p12)
}
  0x3b   :  { %s809_s21 = scalar_lea.vmem %s975_s22, 1024  ;;  %p814_p0 = scmp.lt.s32.totalorder %s975_s22, %s975_s22 }
  0x3c   :  { %p810_p13 = scmp.ne.s32.totalorder %s975_s22, %s809_s21  ;;  %p815_p1 = scmp.lt.s32.totalorder %s809_s21, %s809_s21 }
  0x3e   :  { %p816_p2 = por %p815_p1, %p814_p0 }
  0x40   :  { %p817_p3 = pnand %p816_p2, %p810_p13 }
  0x42   :  { %820 = shalt.err (!%p817_p3)
}
  0x43   :  { %56 = dma.hbm_to_vmem [thread:$0]  %s1093_s3, 1024, %s975_s22, [#allocation6], %s875_s25, %s875_s25, %s876_s26  }
  0x44   :  { %s879_s23 = smov [#allocation10]   ;;  %s821_s29 = scalar_lea.hbm %s1097_s7, 1024 }
  0x45   :  { %s78_s24 = sshll.u32 %s879_s23, 4  ;;  %p822_p4 = scmp.ne.s32.totalorder %s1097_s7, %s821_s29  ;;  %s79_s24 = int_to_ptr.vmem [resolvable:$true] %s78_s24 }
  0x46   :  { %p825_p5 = scmp.lt.u32.totalorder %s821_s29, %s1097_s7 }
  0x48   :  { %p827_p6 = pnand %p825_p5, %p822_p4 }
  0x4a   :  { %830 = shalt.err (!%p827_p6)
}
  0x4b   :  { %s831_s12 = scalar_lea.vmem %s79_s24, 1024  ;;  %p836_p8 = scmp.lt.s32.totalorder %s79_s24, %s79_s24 }
  0x4c   :  { %p832_p7 = scmp.ne.s32.totalorder %s79_s24, %s831_s12  ;;  %p837_p9 = scmp.lt.s32.totalorder %s831_s12, %s831_s12 }
  0x4e   :  { %p838_p10 = por %p837_p9, %p836_p8 }
  0x50   :  { %p839_p11 = pnand %p838_p10, %p832_p7 }
  0x52   :  { %842 = shalt.err (!%p839_p11)
}
  0x53   :  { %84 = dma.hbm_to_vmem [thread:$0]  %s1097_s7, 1024, %s79_s24, [#allocation9], %s875_s25, %s875_s25, %s876_s26  }
  0x54   :  { %865 = dma.done.wait [#allocation3], 128  }
  0x55   :  { %866 = vsyncadd [#allocation3], 4294967168 }
  0x56   :  { %867 = dma.done.wait [#allocation6], 1152  }
  0x57   :  { %868 = vsyncadd [#allocation6], 4294966144 }
  0x58   :  { %869 = dma.done.wait [#allocation9], 2048  }
  0x59   :  { %870 = vsyncadd [#allocation9], 4294965248  ;;  %v880_v0 = vmov 0.0   ;;  %vm881_vm0 = vmmov 0   ;;  %v703_v1 = vld [vmem:[#allocation5] sm:$0xff]   ;;  %v704_v2 = vld [vmem:[#allocation2] sm:$0xff]  }
  0x5a   :  { %627 = vmatprep.subr.bf16.mxu0 %v880_v0  ;;  %629 = vmatprep.mubr.msk.bf16.mxu0 %vm881_vm0, %v880_v0  ;;  %vm127_vm1 = vcmask 130048   ;;  %v705_v3 = vld [vmem:[#allocation7] sm:$0xff]   ;;  %v706_v4 = vld [vmem:[#allocation7 + $0x8] sm:$0xff]   ;;  %v707_v5 = vld [vmem:[#allocation7 + $0x10] sm:$0xff]   ;;  %s882_s19 = smov [#allocation11]  }
  0x5b   :  { %633 = vmatprep.subr.bf16.mxu1 %v880_v0  ;;  %649 = vmatprep.mubr.msk.bf16.mxu1 %vm881_vm0, %v880_v0  ;;  %v708_v6 = vld [vmem:[#allocation7 + $0x18] sm:$0xff]   ;;  %v709_v7 = vld [vmem:[#allocation7 + $0x20] sm:$0xff]   ;;  %v710_v8 = vld [vmem:[#allocation7 + $0x28] sm:$0xff]   ;;  %s543_s21 = sshll.u32 %s882_s19, 4  ;;  %s544_s21 = int_to_ptr.vmem [resolvable:$true] %s543_s21 }
  0x5c   :  { %628 = vmatpush3.bf16.msra.mxu0 %v703_v1  ;;  %634 = vmatpush3.bf16.msra.mxu1 %v705_v3  ;;  %v711_v9 = vld [vmem:[#allocation7 + $0x30] sm:$0xff]   ;;  %v712_v10 = vld [vmem:[#allocation7 + $0x38] sm:$0xff]   ;;  %v713_v11 = vld [vmem:[#allocation8] sm:$0xff]   ;;  %p848_p13 = scmp.lt.s32.totalorder %s544_s21, %s544_s21 }
  0x5d   :  { %653 = vmatprep.subr.bf16.mxu0 %v880_v0  ;;  %635 = vmatprep.subr.bf16.mxu1 %v880_v0  ;;  %v714_v12 = vld [vmem:[#allocation8 + $0x8] sm:$0xff]   ;;  %v715_v13 = vld [vmem:[#allocation8 + $0x10] sm:$0xff]   ;;  %v716_v14 = vld [vmem:[#allocation8 + $0x18] sm:$0xff]  }
  0x5e   :  { %v717_v15 = vld [vmem:[#allocation8 + $0x20] sm:$0xff]   ;;  %v718_v16 = vld [vmem:[#allocation8 + $0x28] sm:$0xff]   ;;  %v557_v17 = vld [vmem:[%s1092_s2] ss:$0 sm:$0xff] }
  0x5f   :  { %630 = vmatmul.mubr.msk.bf16.vlgmr.msra.gmra.mrb[0].mxu0 %vm127_vm1, %v704_v2  ;;  %v719_v27 = vld [vmem:[#allocation8 + $0x30] sm:$0xff]   ;;  %v720_v28 = vld [vmem:[#allocation8 + $0x38] sm:$0xff]   ;;  %v721_v29 = vld [vmem:[#allocation10] sm:$0xff]  }
  0x60   :  { %669 = vmatprep.mubr.msk.bf16.mxu0 %vm881_vm0, %v880_v0  ;;  %636 = vmatpush3.bf16.msra.mxu1 %v706_v4  ;;  %v722_v30 = vld [vmem:[#allocation10 + $0x8] sm:$0xff]   ;;  %v723_v31 = vld [vmem:[#allocation10 + $0x10] sm:$0xff]   ;;  %v724_v32 = vld [vmem:[#allocation10 + $0x18] sm:$0xff]  }
  0x61   :  { %637 = vmatprep.subr.bf16.mxu1 %v880_v0  ;;  %654 = vmatpush3.bf16.msra.mxu0 %v713_v11  ;;  %v725_v33 = vld [vmem:[#allocation10 + $0x20] sm:$0xff]   ;;  %v726_v34 = vld [vmem:[#allocation10 + $0x28] sm:$0xff]   ;;  %v561_v35 = vld [vmem:[%s1094_s4] ss:$0 sm:$0xff] }
  0x62   :  { %655 = vmatprep.subr.bf16.mxu0 %v880_v0  ;;  %v727_v45 = vld [vmem:[#allocation10 + $0x30] sm:$0xff]   ;;  %v728_v46 = vld [vmem:[#allocation10 + $0x38] sm:$0xff]  }
  0x63   :  { %v570_v47 = vld [vmem:[%s1096_s6] ss:$0 sm:$0xff] }
  0x64   :  { %638 = vmatpush3.bf16.msra.mxu1 %v707_v5  ;;  %v579_v57 = vld [vmem:[%s1098_s8] ss:$0 sm:$0xff]  ;;  %s843_s8 = scalar_lea.vmem %s544_s21, 128 }
  0x65   :  { %639 = vmatprep.subr.bf16.mxu1 %v880_v0  ;;  %656 = vmatpush3.bf16.msra.mxu0 %v714_v12  ;;  %v588_v1 = vld [vmem:[%s1099_s9] ss:$0 sm:$0xff]  ;;  %p844_p12 = scmp.ne.s32.totalorder %s544_s21, %s843_s8  ;;  %p849_p0 = scmp.lt.s32.totalorder %s843_s8, %s843_s8 }
  0x66   :  { %657 = vmatprep.subr.bf16.mxu0 %v880_v0 }
  0x67   :  { %p850_p1 = por %p849_p0, %p848_p13 }
  0x68   :  { %640 = vmatpush3.bf16.msra.mxu1 %v708_v6 }
  0x69   :  { %641 = vmatprep.subr.bf16.mxu1 %v880_v0  ;;  %658 = vmatpush3.bf16.msra.mxu0 %v715_v13  ;;  %p851_p2 = pnand %p850_p1, %p844_p12 }
  0x6a   :  { %659 = vmatprep.subr.bf16.mxu0 %v880_v0 }
  0x6c   :  { %642 = vmatpush3.bf16.msra.mxu1 %v709_v7 }
  0x6d   :  { %643 = vmatprep.subr.bf16.mxu1 %v880_v0  ;;  %660 = vmatpush3.bf16.msra.mxu0 %v716_v14 }
  0x6e   :  { %661 = vmatprep.subr.bf16.mxu0 %v880_v0 }
  0x70   :  { %644 = vmatpush3.bf16.msra.mxu1 %v710_v8 }
  0x71   :  { %645 = vmatprep.subr.bf16.mxu1 %v880_v0  ;;  %662 = vmatpush3.bf16.msra.mxu0 %v717_v15 }
  0x72   :  { %663 = vmatprep.subr.bf16.mxu0 %v880_v0 }
  0x74   :  { %646 = vmatpush3.bf16.msra.mxu1 %v711_v9 }
  0x75   :  { %647 = vmatprep.subr.bf16.mxu1 %v880_v0  ;;  %664 = vmatpush3.bf16.msra.mxu0 %v718_v16 }
  0x76   :  { %665 = vmatprep.subr.bf16.mxu0 %v880_v0 }
  0x78   :  { %648 = vmatpush3.bf16.msra.mxu1 %v712_v10 }
  0x79   :  { %673 = vmatprep.subr.bf16.mxu1 %v880_v0  ;;  %666 = vmatpush3.bf16.msra.mxu0 %v719_v27 }
  0x7a   :  { %667 = vmatprep.subr.bf16.mxu0 %v880_v0 }
  0x7d   :  { %668 = vmatpush3.bf16.msra.mxu0 %v720_v28 }
 0x132   :  { %v165_v18 = vpop.f32.mrb[0].mxu0 }
 0x133   :  { %v166_v19 = vadd.f32 %v557_v17, %v165_v18  ;;  %v631_v20 = vpop.f32.mrb[1].mxu0 }
 0x134   :  { %v168_v21 = vpop.f32.mrb[2].mxu0 }
 0x135   :  { %v169_v22 = vadd.f32 %v557_v17, %v168_v21  ;;  %v632_v23 = vpop.f32.mrb[3].mxu0  ;;  %v172_v24 = vmax.f32 %v166_v19, 0.0 }
 0x137   :  { %v173_v25 = vmax.f32 %v169_v22, 0.0 }
 0x139   :  { %v174_v26 = vpack.c.bf16 %v173_v25, %v172_v24 }
 0x13b   :  { %650 = vmatmul.mubr.bf16.vlgmr.msra.gmra.mrb[0].mxu1 %v174_v26 }
 0x13c   :  { %689 = vmatprep.mubr.msk.bf16.mxu1 %vm881_vm0, %v880_v0  ;;  %674 = vmatpush3.bf16.msra.mxu1 %v721_v29 }
 0x13d   :  { %675 = vmatprep.subr.bf16.mxu1 %v880_v0 }
 0x140   :  { %676 = vmatpush3.bf16.msra.mxu1 %v722_v30 }
 0x141   :  { %677 = vmatprep.subr.bf16.mxu1 %v880_v0 }
 0x144   :  { %678 = vmatpush3.bf16.msra.mxu1 %v723_v31 }
 0x145   :  { %679 = vmatprep.subr.bf16.mxu1 %v880_v0 }
 0x148   :  { %680 = vmatpush3.bf16.msra.mxu1 %v724_v32 }
 0x149   :  { %681 = vmatprep.subr.bf16.mxu1 %v880_v0 }
 0x14c   :  { %682 = vmatpush3.bf16.msra.mxu1 %v725_v33 }
 0x14d   :  { %683 = vmatprep.subr.bf16.mxu1 %v880_v0 }
 0x150   :  { %684 = vmatpush3.bf16.msra.mxu1 %v726_v34 }
 0x151   :  { %685 = vmatprep.subr.bf16.mxu1 %v880_v0 }
 0x154   :  { %686 = vmatpush3.bf16.msra.mxu1 %v727_v45 }
 0x155   :  { %687 = vmatprep.subr.bf16.mxu1 %v880_v0 }
 0x158   :  { %688 = vmatpush3.bf16.msra.mxu1 %v728_v46 }
 0x20e   :  { %v280_v36 = vpop.f32.mrb[0].mxu1 }
 0x20f   :  { %v281_v37 = vadd.f32 %v561_v35, %v280_v36  ;;  %v651_v38 = vpop.f32.mrb[1].mxu1 }
 0x210   :  { %v283_v39 = vpop.f32.mrb[2].mxu1 }
 0x211   :  { %v284_v40 = vadd.f32 %v561_v35, %v283_v39  ;;  %v652_v41 = vpop.f32.mrb[3].mxu1  ;;  %v287_v42 = vmax.f32 %v281_v37, 0.0 }
 0x213   :  { %v288_v43 = vmax.f32 %v284_v40, 0.0 }
 0x215   :  { %v289_v44 = vpack.c.bf16 %v288_v43, %v287_v42 }
 0x217   :  { %670 = vmatmul.mubr.bf16.vlgmr.msra.gmra.mrb[4].mxu0 %v289_v44 }
 0x2ea   :  { %v395_v48 = vpop.f32.mrb[4].mxu0 }
 0x2eb   :  { %v396_v49 = vadd.f32 %v570_v47, %v395_v48  ;;  %v671_v50 = vpop.f32.mrb[5].mxu0 }
 0x2ec   :  { %v398_v51 = vpop.f32.mrb[6].mxu0 }
 0x2ed   :  { %v399_v52 = vadd.f32 %v570_v47, %v398_v51  ;;  %v672_v53 = vpop.f32.mrb[7].mxu0  ;;  %v402_v54 = vmax.f32 %v396_v49, 0.0 }
 0x2ef   :  { %v403_v55 = vmax.f32 %v399_v52, 0.0 }
 0x2f1   :  { %v404_v56 = vpack.c.bf16 %v403_v55, %v402_v54 }
 0x2f3   :  { %690 = vmatmul.mubr.bf16.vlgmr.msra.gmra.mrb[4].mxu1 %v404_v56 }
 0x3c6   :  { %v510_v58 = vpop.f32.mrb[4].mxu1 }
 0x3c7   :  { %v511_v59 = vadd.f32 %v579_v57, %v510_v58  ;;  %v691_v60 = vpop.f32.mrb[5].mxu1 }
 0x3c8   :  { %v513_v61 = vpop.f32.mrb[6].mxu1 }
 0x3c9   :  { %729 = vtanh.f32 %v511_v59  ;;  %v514_v62 = vadd.f32 %v579_v57, %v513_v61  ;;  %v692_v63 = vpop.f32.mrb[7].mxu1 }
 0x3cb   :  { %731 = vtanh.f32 %v514_v62 }
 0x3d3   :  { %v730_v0 = vpop.eup %729 }
 0x3d4   :  { %v526_v3 = vmul.f32 %v730_v0, %v588_v1 }
 0x3d5   :  { %v732_v2 = vpop.eup %731 }
 0x3d6   :  { %v527_v4 = vmul.f32 %v732_v2, %v588_v1 }
 0x3d8   :  { %v596_v5 = vpack.c.bf16 %v527_v4, %v526_v3 }
 0x3da   :  { %597 = vst [vmem:[#allocation11] sm:$0xff] %v596_v5  }
 0x3db   :  { %854 = shalt.err (!%p851_p2)
}
 0x3dc   :  { %s855_s23 = scalar_lea.hbm %s1100_s10, 128 }
 0x3dd   :  { %p856_p3 = scmp.ne.s32.totalorder %s1100_s10, %s855_s23  ;;  %p859_p4 = scmp.lt.u32.totalorder %s855_s23, %s1100_s10 }
 0x3df   :  { %p861_p5 = pnand %p859_p4, %p856_p3 }
 0x3e1   :  { %864 = shalt.err (!%p861_p5)
}
 0x3e2   :  { %549 = dma.vmem_to_hbm [thread:$0]  %s544_s21, 128, %s1100_s10, [#allocation4], %s875_s25, %s875_s25, %s876_s26  }
 0x3e3   :  { %871 = dma.done.wait [#allocation4], 128  }
 0x3e4   :  { %872 = vsyncadd [#allocation4], 4294967168 }
 0x3e5   :  { %553 = vsyncpa [#allocation3], 1 }
 0x3e6   :  { %554 = vsyncpa [#allocation6], 1 }
 0x3e7   :  { %555 = vsyncpa [#allocation9], 1 }
 0x3e8   :  { %556 = vsyncpa [#allocation4], 1 }

</bundles_post_ra>
